<compile_context>
chip_gen: v7x
topology: tpu7x:2x2x1
jax: 0.10.0
libtpu: 0.0.40
codegen_flags: <defaults>
</compile_context>

<pallas_src>
import jax
import jax.numpy as jnp
from jax.experimental import pallas as pl
from jax.experimental.pallas import tpu as pltpu

_LANE = 128


def _swish_kernel(x_ref, o_ref):
    x = x_ref[...]
    # Compute in f32; exact divide (the binding resource is HBM bandwidth, so
    # the EUP exp and the VALU/EUP divide are free filler under the DMA).
    xf = x.astype(jnp.float32)
    y = xf / (1.0 + jnp.exp(-xf))
    o_ref[...] = y.astype(o_ref.dtype)


def _default_block_bytes():
    """Generation-aware block size: 2 MiB on v5e (16 MiB scoped VMEM), 4 MiB
    on v6e/v7x (and anything unknown falls back to the safe 2 MiB)."""
    try:
        kind = jax.devices()[0].device_kind.lower()
    except Exception:
        kind = ""
    if ("v5 lite" in kind) or ("v5e" in kind) or ("v5litepod" in kind):
        return 2 * 1024 * 1024
    if ("v6" in kind) or ("v7" in kind):
        return 4 * 1024 * 1024
    return 2 * 1024 * 1024  # safe default (fits every generation's scoped VMEM)


def swish(x, *, target_block_bytes=None):
    """Swish/SiLU: x / (1 + exp(-x)), matching torch shape, dtype and values."""
    orig_shape = x.shape
    orig_dtype = x.dtype
    itemsize = jnp.dtype(orig_dtype).itemsize
    if target_block_bytes is None:
        target_block_bytes = _default_block_bytes()

    # Packed-sublane multiple for the dtype: f32 -> 8, bf16 -> 16, int8/fp8 -> 32.
    sub_mult = max(8, 32 // itemsize)

    flat = x.reshape(-1)
    n = flat.shape[0]
    if n == 0:
        return x

    rows = n // _LANE
    tail = n - rows * _LANE

    pieces = []

    if rows > 0:
        # Main lane-aligned slab: (rows, 128).  In the aligned case this is
        # the whole array (no extra pad/slice HBM passes).
        x2d = flat[: rows * _LANE].reshape(rows, _LANE)

        # Row tile sized for ~target_block_bytes per block.  With 1 input +
        # 1 output double-buffered the resident footprint is ~4x the tile:
        #   2 MiB tile ->  8 MiB resident (fits v5e's 16 MiB scoped VMEM)
        #   4 MiB tile -> 16 MiB resident (fits v6e/v7x's 32 MiB scoped VMEM)
        tr = (target_block_bytes // (_LANE * itemsize)) // sub_mult * sub_mult
        tr = max(tr, sub_mult)
        rows_up = -(-rows // sub_mult) * sub_mult
        tr = min(tr, rows_up)

        # cdiv grid: Pallas masks the ragged last block, so tiles stay large
        # for any input size (no divisibility-driven tile shrink).
        grid = (pl.cdiv(rows, tr),)

        out2d = pl.pallas_call(
            _swish_kernel,
            out_shape=jax.ShapeDtypeStruct((rows, _LANE), orig_dtype),
            grid_spec=pltpu.PrefetchScalarGridSpec(
                num_scalar_prefetch=0,
                grid=grid,
                in_specs=[pl.BlockSpec((tr, _LANE), lambda i: (i, 0))],
                out_specs=pl.BlockSpec((tr, _LANE), lambda i: (i, 0)),
            ),
            compiler_params=pltpu.CompilerParams(
                # Single independent axis -> eligible for sharding across
                # both TensorCores on v7x.
                dimension_semantics=("parallel",),
            ),
        )(x2d)
        pieces.append(out2d.reshape(-1))

    if tail:
        # <128-element tail: negligible work, computed with plain jnp ops so
        # the unaligned case avoids a full-array pad + slice (each of which
        # would have been an extra full HBM read+write pass).
        t = flat[rows * _LANE :].astype(jnp.float32)
        pieces.append((t / (1.0 + jnp.exp(-t))).astype(orig_dtype))

    out_flat = pieces[0] if len(pieces) == 1 else jnp.concatenate(pieces)
    return out_flat.reshape(orig_shape)


def swish_ref(x):
    xf = x.astype(jnp.float32)
    return (xf / (1.0 + jnp.exp(-xf))).astype(x.dtype)


if __name__ == "__main__":
    key = jax.random.PRNGKey(0)
    # NCHW input, consistent with PyTorch conv-style usage of Swish.
    x = jax.random.normal(key, (2, 4, 16, 16), dtype=jnp.float32)

    y = swish(x)
    jax.block_until_ready(y)

    y_ref = swish_ref(x)
    assert y.shape == x.shape and y.dtype == x.dtype
    # Exact divide in the kernel -> tight tolerance vs the reference.
    assert jnp.allclose(y, y_ref, atol=1e-6, rtol=1e-6)

    print("KERNEL_OK")
</pallas_src>

<mosaic_0001>
module attributes {stable_mosaic.version = 11 : i64} {
  func.func @_swish_kernel(%arg0: i32, %arg1: memref<16x128xf32, #tpu.memory_space<vmem>>, %arg2: memref<16x128xf32, #tpu.memory_space<vmem>>) attributes {dimension_semantics = [#tpu.dimension_semantics<parallel>], iteration_bounds = array<i64: 1>, scalar_prefetch = 0 : i64, scratch_operands = 0 : i64, tpu.core_type = #tpu.core_type<tc>, window_params = [{transform_indices = @transform_0, window_bounds = array<i64: 16, 128>}, {transform_indices = @transform_1, window_bounds = array<i64: 16, 128>}]} {
    %c0 = arith.constant 0 : index
    %c0_0 = arith.constant 0 : index
    %0 = vector.load %arg1[%c0, %c0_0] : memref<16x128xf32, #tpu.memory_space<vmem>>, vector<16x128xf32>
    %cst = arith.constant 0.000000e+00 : f32
    %1 = vector.broadcast %cst : f32 to vector<16x128xf32>
    %2 = arith.subf %1, %0 : vector<16x128xf32>
    %3 = math.exp %2 : vector<16x128xf32>
    %cst_1 = arith.constant 1.000000e+00 : f32
    %4 = vector.broadcast %cst_1 : f32 to vector<16x128xf32>
    %5 = arith.addf %4, %3 : vector<16x128xf32>
    %6 = arith.divf %0, %5 : vector<16x128xf32>
    %c0_2 = arith.constant 0 : index
    %c0_3 = arith.constant 0 : index
    %7 = vector.load %arg2[%c0_2, %c0_3] : memref<16x128xf32, #tpu.memory_space<vmem>>, vector<16x128xf32>
    tpu.vector_store %arg2[%c0_2, %c0_3], %6 {strides = array<i32>} : memref<16x128xf32, #tpu.memory_space<vmem>>, vector<16x128xf32>,
    return
  }
  func.func @transform_0(%arg0: i32) -> (i32, i32) {
    %c0_i32 = arith.constant 0 : i32
    %c0_i32_0 = arith.constant 0 : i32
    return %arg0, %c0_i32 : i32, i32
  }
  func.func @transform_1(%arg0: i32) -> (i32, i32) {
    %c0_i32 = arith.constant 0 : i32
    %c0_i32_0 = arith.constant 0 : i32
    return %arg0, %c0_i32 : i32, i32
  }
}

</mosaic_0001>

<bundles_post_ra>
// kernel: tpu_custom_call.1
= control target key start
LH: loop header
LB: loop body
LE: loop exit
PB: predicated region body
PF: predicated region fallthrough
CT: control target
= control target key end

     0   :  { %6 = vsyncpa [#allocation3], 0  ;;  %s160_s0 = inlined_call_operand.hbm [shape: f32[16,128], index: 0, kind: input, shape index: {}]   ;;  %s161_s1 = inlined_call_operand.hbm [shape: f32[16,128], index: 1, kind: output, shape index: {}]  }
   0x1   :  { %7 = vsyncpa [#allocation4], 0  ;;  %s116_s6 = smov [#allocation2]   ;;  %s68_s10 = scalar_lea.hbm %s160_s0, 256 }
   0x2   :  { %s13_s7 = sshll.u32 %s116_s6, 4  ;;  %p69_p0 = scmp.ne.s32.totalorder %s160_s0, %s68_s10  ;;  %s14_s7 = int_to_ptr.vmem [resolvable:$true] %s13_s7 }
   0x3   :  { %p72_p1 = scmp.lt.u32.totalorder %s68_s10, %s160_s0 }
   0x5   :  { %p74_p2 = pnand %p72_p1, %p69_p0 }
   0x7   :  { %77 = shalt.err (!%p74_p2)
}
   0x8   :  { %s78_s15 = scalar_lea.vmem %s14_s7, 256  ;;  %p83_p4 = scmp.lt.s32.totalorder %s14_s7, %s14_s7 }
   0x9   :  { %p79_p3 = scmp.ne.s32.totalorder %s14_s7, %s78_s15  ;;  %p84_p5 = scmp.lt.s32.totalorder %s78_s15, %s78_s15 }
   0xb   :  { %p85_p6 = por %p84_p5, %p83_p4 }
   0xd   :  { %p86_p7 = pnand %p85_p6, %p79_p3 }
   0xf   :  { %89 = shalt.err (!%p86_p7)
}
  0x10   :  { %s117_s16 = smov 128   ;;  %s118_s17 = smov 8  }
  0x11   :  { %19 = dma.hbm_to_vmem [thread:$0]  %s160_s0, 256, %s14_s7, [#allocation3], %s117_s16, %s117_s16, %s118_s17  }
  0x12   :  { %112 = dma.done.wait [#allocation3], 256  }
  0x13   :  { %113 = vsyncadd [#allocation3], 4294967040  ;;  %v23_v0 = vld [vmem:[#allocation2] sm:$0xff]  ;;  %v24_v1 = vld [vmem:[#allocation2 + $0x8] sm:$0xff]  ;;  %s119_s20 = smov [#allocation5]  }
  0x14   :  { %v25_v2 = vsub.f32 0.0, %v23_v0  ;;  %v26_v3 = vsub.f32 0.0, %v24_v1  ;;  %s44_s21 = sshll.u32 %s119_s20, 4  ;;  %s45_s21 = int_to_ptr.vmem [resolvable:$true] %s44_s21 }
  0x15   :  { %s90_s0 = scalar_lea.vmem %s45_s21, 256  ;;  %p95_p9 = scmp.lt.s32.totalorder %s45_s21, %s45_s21 }
  0x16   :  { %v27_v4 = vmul.f32 1.442695, %v25_v2  ;;  %v29_v5 = vmul.f32 1.442695, %v26_v3  ;;  %p91_p8 = scmp.ne.s32.totalorder %s45_s21, %s90_s0  ;;  %p96_p10 = scmp.lt.s32.totalorder %s90_s0, %s90_s0 }
  0x18   :  { %60 = vpow2.f32 %v27_v4  ;;  %p97_p11 = por %p96_p10, %p95_p9 }
  0x19   :  { %62 = vpow2.f32 %v29_v5 }
  0x1a   :  { %p98_p12 = pnand %p97_p11, %p91_p8 }
  0x22   :  { %v61_v6 = vpop.eup %60 }
  0x23   :  { %v63_v7 = vpop.eup %62  ;;  %v31_v8 = vadd.f32 1.0, %v61_v6 }
  0x24   :  { %v32_v9 = vadd.f32 1.0, %v63_v7 }
  0x25   :  { %64 = vrcp.f32 %v31_v8 }
  0x26   :  { %66 = vrcp.f32 %v32_v9 }
  0x2f   :  { %v65_v10 = vpop.eup %64 }
  0x30   :  { %v67_v11 = vpop.eup %66  ;;  %v34_v12 = vmul.f32 %v65_v10, %v23_v0 }
  0x31   :  { %v36_v13 = vmul.f32 %v67_v11, %v24_v1 }
  0x32   :  { %37 = vst [vmem:[#allocation5] sm:$0xff] %v34_v12 }
  0x33   :  { %38 = vst [vmem:[#allocation5 + $0x8] sm:$0xff] %v36_v13 }
  0x34   :  { %101 = shalt.err (!%p98_p12)
}
  0x35   :  { %s102_s24 = scalar_lea.hbm %s161_s1, 256 }
  0x36   :  { %p103_p13 = scmp.ne.s32.totalorder %s161_s1, %s102_s24  ;;  %p106_p0 = scmp.lt.u32.totalorder %s102_s24, %s161_s1 }
  0x38   :  { %p108_p1 = pnand %p106_p0, %p103_p13 }
  0x3a   :  { %111 = shalt.err (!%p108_p1)
}
  0x3b   :  { %50 = dma.vmem_to_hbm [thread:$0]  %s45_s21, 256, %s161_s1, [#allocation4], %s117_s16, %s117_s16, %s118_s17  }
  0x3c   :  { %114 = dma.done.wait [#allocation4], 256  }
  0x3d   :  { %115 = vsyncadd [#allocation4], 4294967040 }
  0x3e   :  { %54 = vsyncpa [#allocation3], 1 }
  0x3f   :  { %55 = vsyncpa [#allocation4], 1 }

</bundles_post_ra>
